<compile_context>
chip_gen: v6e
topology: v6e:2x2x1
jax: 0.10.0
libtpu: 0.0.40
codegen_flags: <defaults>
</compile_context>

<pallas_src>
import functools

import jax
import jax.numpy as jnp
from jax.experimental import pallas as pl
from jax.experimental.pallas import tpu as pltpu

NUM_CLASSES = 10
C_PAD = 16          # class dim padded to a sublane multiple (>= NUM_CLASSES)
PAD_NEG = -1e9      # padded-class bias -> softmax prob == 0, gradient == 0
LR = 1e-3


# ------------------------------ fused kernel --------------------------------
# One kernel invocation == ALL Tent adaptation steps (fori_loop over steps).

def _make_tent_kernel(steps):
    def kernel(x_ref, w0_ref, b0_ref, logits_ref, w_ref, b_ref):
        x_f32 = x_ref[...]                                    # [B, D] f32
        x_bf16 = x_f32.astype(jnp.bfloat16)                   # MXU operand (hoisted)
        B = x_f32.shape[0]
        inv_b = 1.0 / B

        def step_fn(_, carry):
            w_cur, b_cur, _ = carry                           # [C_PAD, D], [1, C_PAD]

            # forward: z = x @ W^T + b  (bf16 MXU inputs, f32 accumulate)
            z = jax.lax.dot_general(
                x_bf16, w_cur.astype(jnp.bfloat16),
                dimension_numbers=(((1,), (1,)), ((), ())),
                preferred_element_type=jnp.float32) + b_cur   # [B, C_PAD]

            # ourloss (gamma=1, conf_threshold=0.5, a1=a2=1) + analytic grad.
            # Softmax/entropy stay f32 so padded cols give p == 0 exactly.
            m = jnp.max(z, axis=1, keepdims=True)
            ez = jnp.exp(z - m)
            s = jnp.sum(ez, axis=1, keepdims=True)
            p = ez * pl.reciprocal(s, approx=True)            # divide -> EUP slot
            logp = (z - m) - jnp.log(s)
            H = -jnp.sum(p * logp, axis=1, keepdims=True)     # entropy [B, 1]

            # top-1 / top-2 probabilities (value-equivalent to torch.sort desc)
            pred = jnp.max(p, axis=1, keepdims=True)
            col = jax.lax.broadcasted_iota(jnp.int32, p.shape, 1)
            first_idx = jnp.min(jnp.where(p >= pred, col, p.shape[1]),
                                axis=1, keepdims=True)
            sub_pred = jnp.max(jnp.where(col == first_idx, -jnp.inf, p),
                               axis=1, keepdims=True)
            # detached per-sample weight; loss_i = (1 - w_i) * H_i, loss = mean
            wgt = jnp.where(pred > 0.5, 1.0 - (pred - sub_pred), 0.0)

            # d(loss)/dz = (1 - w_i)/B * dH/dz,  dH/dz_j = -p_j (logp_j + H)
            dz = ((1.0 - wgt) * inv_b) * (-(p * (logp + H)))  # [B, C_PAD] f32

            # gradient, lane-dense layout: dW^T = dz^T @ x -> [C_PAD, D]
            dwT = jax.lax.dot_general(
                dz.astype(jnp.bfloat16), x_bf16,
                dimension_numbers=(((0,), (0,)), ((), ())),
                preferred_element_type=jnp.float32)
            db = jnp.sum(dz, axis=0, keepdims=True)           # [1, C_PAD]

            # plain SGD (f32 state); padded rows/cols receive exactly zero grad
            # so the padding is self-preserving across steps.
            return (w_cur - LR * dwT, b_cur - LR * db, z)

        init = (w0_ref[...], b0_ref[...], jnp.zeros((B, C_PAD), jnp.float32))
        w_fin, b_fin, z_last = jax.lax.fori_loop(0, steps, step_fn, init,
                                                 unroll=True)

        # single final stores: z_last uses the last step's PRE-update params.
        logits_ref[...] = z_last
        w_ref[...] = w_fin
        b_ref[...] = b_fin

    return kernel


@functools.partial(jax.jit, static_argnames=("steps", "num_classes"))
def tent_forward_and_adapt(x_flat, wT, b_pad, *, steps, num_classes):
    """All Tent adaptation steps in ONE fused (gridless) pallas_call."""
    B, D = x_flat.shape
    cost = pl.CostEstimate(
        flops=4 * steps * B * D * C_PAD,                      # fwd + grad matmuls
        transcendentals=steps * B * (C_PAD + 1),              # exp + log per row
        bytes_accessed=4 * (B * D + 2 * C_PAD * D + 4 * C_PAD + B * C_PAD),
    )
    logits_pad, wT_new, b_new = pl.pallas_call(
        _make_tent_kernel(steps),
        out_shape=(
            jax.ShapeDtypeStruct((B, C_PAD), jnp.float32),
            jax.ShapeDtypeStruct((C_PAD, D), jnp.float32),
            jax.ShapeDtypeStruct((1, C_PAD), jnp.float32),
        ),
        in_specs=[pl.BlockSpec(memory_space=pltpu.MemorySpace.VMEM)] * 3,
        out_specs=(pl.BlockSpec(memory_space=pltpu.MemorySpace.VMEM),) * 3,
        # parameters update in place: wT -> wT_new, b_pad -> b_new
        input_output_aliases={1: 1, 2: 2},
        cost_estimate=cost,
    )(x_flat, wT, b_pad)
    return logits_pad[:, :num_classes], wT_new, b_new


# ---------------- verification-only loss kernel (off the hot path) ----------

def _ourloss_kernel(z_ref, loss_ref):
    z = z_ref[...].astype(jnp.float32)                        # [B, C]
    B, C = z.shape
    m = jnp.max(z, axis=1, keepdims=True)
    ez = jnp.exp(z - m)
    s = jnp.sum(ez, axis=1, keepdims=True)
    p = ez / s
    logp = (z - m) - jnp.log(s)
    H = -jnp.sum(p * logp, axis=1, keepdims=True)
    pred = jnp.max(p, axis=1, keepdims=True)
    col = jax.lax.broadcasted_iota(jnp.int32, (B, C), 1)
    first_idx = jnp.min(jnp.where(p >= pred, col, C), axis=1, keepdims=True)
    sub_pred = jnp.max(jnp.where(col == first_idx, -jnp.inf, p),
                       axis=1, keepdims=True)
    wgt = jnp.where(pred > 0.5, 1.0 - (pred - sub_pred), 0.0)
    loss_ref[...] = jnp.sum((1.0 - wgt) * H, axis=(0, 1), keepdims=True) / B


def ourloss_value(logits):
    """ourloss(logits) -- used only for the correctness check in __main__."""
    loss = pl.pallas_call(
        _ourloss_kernel,
        out_shape=jax.ShapeDtypeStruct((1, 1), jnp.float32),
    )(logits)
    return loss[0, 0]


# ----------------------- parameter layout helpers ---------------------------

def _pack_params(w, b):
    """[D, C] weight / [1, C] bias -> lane-dense transposed, class-padded."""
    D, C = w.shape
    assert C <= C_PAD
    wT = jnp.zeros((C_PAD, D), jnp.float32).at[:C, :].set(
        jnp.asarray(w, jnp.float32).T)
    b_pad = jnp.full((1, C_PAD), PAD_NEG, jnp.float32).at[:, :C].set(
        jnp.asarray(b, jnp.float32).reshape(1, C))
    return wT, b_pad


def _unpack_params(wT, b_pad, num_classes):
    return wT[:num_classes, :].T, b_pad[:, :num_classes]


# --------------------------- Tent (functional state) ------------------------

class Tent:
    """JAX/Pallas port of Tent: adapts params by entropy minimization each call."""

    # TODO(synk): the PyTorch Tent wraps an arbitrary nn.Module + optimizer; here
    # the model is a synthetic flatten->Linear classifier and the optimizer is
    # plain (stateless) SGD, so copy_model_and_optimizer reduces to a param copy.

    def __init__(self, params, steps=1, episodic=False):
        assert steps > 0, "tent requires >= 1 step(s) to forward and update"
        w, b = params
        self.num_classes = int(w.shape[1])
        self.steps = int(steps)
        self.episodic = episodic
        self.params = _pack_params(w, b)
        # copy_model_and_optimizer: snapshot initial params for reset()
        self.params_state = jax.tree_util.tree_map(
            lambda p: jnp.array(p, copy=True), self.params)

    def reset(self):
        # load_model_and_optimizer: restore saved state (fresh copies).
        self.params = jax.tree_util.tree_map(
            lambda p: jnp.array(p, copy=True), self.params_state)

    def __call__(self, x):
        if self.episodic:
            self.reset()
        x_flat = x.reshape(x.shape[0], -1)
        wT, b_pad = self.params
        outputs, wT_new, b_new = tent_forward_and_adapt(
            x_flat, wT, b_pad, steps=self.steps, num_classes=self.num_classes)
        self.params = (wT_new, b_new)
        return outputs


# ------------------------------- reference ----------------------------------

def _ourloss_jnp(z):
    p = jax.nn.softmax(z, axis=1)
    lp = jax.nn.log_softmax(z, axis=1)
    H = -(p * lp).sum(1)
    top2 = jax.lax.top_k(p, 2)[0]
    wt = jnp.where(top2[:, 0] > 0.5, 1.0 - (top2[:, 0] - top2[:, 1]), 0.0)
    return ((1.0 - wt) * H).mean()


def _ref_adapt(x, w, b):
    """Pure-JAX (f32) reference of one forward_and_adapt step (autodiff grad)."""
    xf = x.reshape(x.shape[0], -1)

    def loss_fn(params):
        w_, b_ = params
        z = xf @ w_ + b_
        p = jax.nn.softmax(z, axis=1)
        lp = jax.nn.log_softmax(z, axis=1)
        H = -(p * lp).sum(1)
        top2 = jax.lax.top_k(p, 2)[0]
        pred, sub = top2[:, 0], top2[:, 1]
        wt = jax.lax.stop_gradient(
            jnp.where(pred > 0.5, (1.0 - (pred - sub)) ** 1, 0.0))
        return (H - wt * H).mean(0)          # entropy + regularization

    loss, grads = jax.value_and_grad(loss_fn)((w, b))
    z = xf @ w + b
    return z, (w - LR * grads[0], b - LR * grads[1]), loss


if __name__ == "__main__":
    key = jax.random.PRNGKey(0)
    kx, kw = jax.random.split(key)

    B, C, H, W = 8, 3, 16, 16
    D = C * H * W
    x = jax.random.normal(kx, (B, C, H, W), dtype=jnp.float32)

    w0 = 0.05 * jax.random.normal(kw, (D, NUM_CLASSES), dtype=jnp.float32)
    b0 = jnp.zeros((1, NUM_CLASSES), dtype=jnp.float32)

    # --- single adaptation step ---
    tent = Tent((w0, b0), steps=1, episodic=False)
    outputs = jax.block_until_ready(tent(x))

    z_ref, (w1_ref, b1_ref), _ = _ref_adapt(x, w0, b0)
    # bf16 MXU operands -> tolerances loosened vs. the pure-f32 reference.
    assert jnp.allclose(outputs, z_ref, atol=2e-2, rtol=1e-2), "logits mismatch"

    # loss kernel vs pure-JAX loss on the SAME logits (tight, both f32)
    loss_k = ourloss_value(outputs)
    assert jnp.allclose(loss_k, _ourloss_jnp(outputs), atol=1e-5, rtol=1e-5), \
        "ourloss mismatch"

    w1_k, b1_k = _unpack_params(*tent.params, NUM_CLASSES)
    assert jnp.allclose(w1_k, w1_ref, atol=1e-4, rtol=1e-3), "weight mismatch"
    assert jnp.allclose(b1_k, b1_ref, atol=1e-4, rtol=1e-3), "bias mismatch"

    # --- multi-step episodic (exercises the in-kernel fori_loop + reset) ---
    tent2 = Tent((w0, b0), steps=2, episodic=True)
    outputs2 = jax.block_until_ready(tent2(x))
    z2_ref, _, _ = _ref_adapt(x, w1_ref, b1_ref)
    assert jnp.allclose(outputs2, z2_ref, atol=2e-2, rtol=1e-2), \
        "multi-step logits mismatch"

    print("KERNEL_OK")
</pallas_src>

<mosaic_0001>
module attributes {stable_mosaic.version = 11 : i64} {
  func.func @kernel(%arg0: memref<8x768xf32, #tpu.memory_space<vmem>>, %arg1: memref<16x768xf32, #tpu.memory_space<vmem>>, %arg2: memref<1x16xf32, #tpu.memory_space<vmem>>, %arg3: memref<8x16xf32, #tpu.memory_space<vmem>>, %arg4: memref<16x768xf32, #tpu.memory_space<vmem>>, %arg5: memref<1x16xf32, #tpu.memory_space<vmem>>) attributes {dimension_semantics = [], scalar_prefetch = 0 : i64, scratch_operands = 0 : i64, tpu.core_type = #tpu.core_type<tc>} {
    %c0 = arith.constant 0 : index
    %c0_0 = arith.constant 0 : index
    %0 = vector.load %arg0[%c0, %c0_0] : memref<8x768xf32, #tpu.memory_space<vmem>>, vector<8x768xf32>
    %1 = arith.truncf %0 : vector<8x768xf32> to vector<8x768xbf16>
    %c0_1 = arith.constant 0 : index
    %c0_2 = arith.constant 0 : index
    %2 = vector.load %arg1[%c0_1, %c0_2] : memref<16x768xf32, #tpu.memory_space<vmem>>, vector<16x768xf32>
    %c0_3 = arith.constant 0 : index
    %c0_4 = arith.constant 0 : index
    %3 = vector.load %arg2[%c0_3, %c0_4] : memref<1x16xf32, #tpu.memory_space<vmem>>, vector<1x16xf32>
    %cst = arith.constant 0.000000e+00 : f32
    %4 = vector.broadcast %cst : f32 to vector<8x16xf32>
    %c0_i32 = arith.constant 0 : i32
    %5 = arith.truncf %2 : vector<16x768xf32> to vector<16x768xbf16>
    %cst_5 = arith.constant dense<0.000000e+00> : vector<8x16xf32>
    %6 = tpu.matmul %1, %5, %cst_5 {dimension_numbers = #tpu.dot_dimension_numbers<[1], [1], [0], [0], [0, 0, 1, 0], [], []>} : vector<8x768xbf16>, vector<16x768xbf16>, vector<8x16xf32> -> vector<8x16xf32>
    %7 = vector.broadcast %3 : vector<1x16xf32> to vector<8x16xf32>
    %8 = arith.addf %6, %7 : vector<8x16xf32>
    %cst_6 = arith.constant dense<0xFF800000> : vector<8xf32>
    %9 = vector.multi_reduction <maximumf>, %8, %cst_6 [1] : vector<8x16xf32> to vector<8xf32>
    %10 = vector.shape_cast %9 : vector<8xf32> to vector<8x1xf32>
    %11 = vector.broadcast %10 : vector<8x1xf32> to vector<8x16xf32>
    %12 = arith.subf %8, %11 : vector<8x16xf32>
    %13 = math.exp %12 : vector<8x16xf32>
    %cst_7 = arith.constant dense<0.000000e+00> : vector<8xf32>
    %14 = vector.multi_reduction <add>, %13, %cst_7 [1] : vector<8x16xf32> to vector<8xf32>
    %15 = vector.shape_cast %14 : vector<8xf32> to vector<8x1xf32>
    %16 = tpu.reciprocal %15 {approx = true} : vector<8x1xf32> -> vector<8x1xf32>
    %17 = vector.broadcast %16 : vector<8x1xf32> to vector<8x16xf32>
    %18 = arith.mulf %13, %17 : vector<8x16xf32>
    %19 = vector.broadcast %10 : vector<8x1xf32> to vector<8x16xf32>
    %20 = arith.subf %8, %19 : vector<8x16xf32>
    %21 = math.log %15 : vector<8x1xf32>
    %22 = vector.broadcast %21 : vector<8x1xf32> to vector<8x16xf32>
    %23 = arith.subf %20, %22 : vector<8x16xf32>
    %24 = arith.mulf %18, %23 : vector<8x16xf32>
    %cst_8 = arith.constant dense<0.000000e+00> : vector<8xf32>
    %25 = vector.multi_reduction <add>, %24, %cst_8 [1] : vector<8x16xf32> to vector<8xf32>
    %26 = vector.shape_cast %25 : vector<8xf32> to vector<8x1xf32>
    %cst_9 = arith.constant 0.000000e+00 : f32
    %27 = vector.broadcast %cst_9 : f32 to vector<8x1xf32>
    %28 = arith.subf %27, %26 : vector<8x1xf32>
    %cst_10 = arith.constant dense<0xFF800000> : vector<8xf32>
    %29 = vector.multi_reduction <maximumf>, %18, %cst_10 [1] : vector<8x16xf32> to vector<8xf32>
    %30 = vector.shape_cast %29 : vector<8xf32> to vector<8x1xf32>
    %31 = tpu.iota {dimensions = array<i32: 1>} : vector<8x16xi32>
    %32 = vector.broadcast %30 : vector<8x1xf32> to vector<8x16xf32>
    %33 = arith.cmpf oge, %18, %32 : vector<8x16xf32>
    %c16_i32 = arith.constant 16 : i32
    %34 = vector.broadcast %c16_i32 : i32 to vector<8x16xi32>
    %35 = arith.select %33, %31, %34 : vector<8x16xi1>, vector<8x16xi32>
    %cst_11 = arith.constant dense<2147483647> : vector<8xi32>
    %36 = vector.multi_reduction <minsi>, %35, %cst_11 [1] : vector<8x16xi32> to vector<8xi32>
    %37 = vector.shape_cast %36 : vector<8xi32> to vector<8x1xi32>
    %38 = vector.broadcast %37 : vector<8x1xi32> to vector<8x16xi32>
    %39 = arith.cmpi eq, %31, %38 : vector<8x16xi32>
    %cst_12 = arith.constant 0xFF800000 : f32
    %40 = vector.broadcast %cst_12 : f32 to vector<8x16xf32>
    %41 = arith.select %39, %40, %18 : vector<8x16xi1>, vector<8x16xf32>
    %cst_13 = arith.constant dense<0xFF800000> : vector<8xf32>
    %42 = vector.multi_reduction <maximumf>, %41, %cst_13 [1] : vector<8x16xf32> to vector<8xf32>
    %43 = vector.shape_cast %42 : vector<8xf32> to vector<8x1xf32>
    %cst_14 = arith.constant 5.000000e-01 : f32
    %44 = vector.broadcast %cst_14 : f32 to vector<8x1xf32>
    %45 = arith.cmpf ogt, %30, %44 : vector<8x1xf32>
    %46 = arith.subf %30, %43 : vector<8x1xf32>
    %cst_15 = arith.constant 1.000000e+00 : f32
    %47 = vector.broadcast %cst_15 : f32 to vector<8x1xf32>
    %48 = arith.subf %47, %46 : vector<8x1xf32>
    %cst_16 = arith.constant 0.000000e+00 : f32
    %49 = vector.broadcast %cst_16 : f32 to vector<8x1xf32>
    %50 = arith.select %45, %48, %49 : vector<8x1xi1>, vector<8x1xf32>
    %cst_17 = arith.constant 1.000000e+00 : f32
    %51 = vector.broadcast %cst_17 : f32 to vector<8x1xf32>
    %52 = arith.subf %51, %50 : vector<8x1xf32>
    %cst_18 = arith.constant 1.250000e-01 : f32
    %53 = vector.broadcast %cst_18 : f32 to vector<8x1xf32>
    %54 = arith.mulf %52, %53 : vector<8x1xf32>
    %55 = vector.broadcast %28 : vector<8x1xf32> to vector<8x16xf32>
    %56 = arith.addf %23, %55 : vector<8x16xf32>
    %57 = arith.mulf %18, %56 : vector<8x16xf32>
    %cst_19 = arith.constant 0.000000e+00 : f32
    %58 = vector.broadcast %cst_19 : f32 to vector<8x16xf32>
    %59 = arith.subf %58, %57 : vector<8x16xf32>
    %60 = vector.broadcast %54 : vector<8x1xf32> to vector<8x16xf32>
    %61 = arith.mulf %60, %59 : vector<8x16xf32>
    %62 = arith.truncf %61 : vector<8x16xf32> to vector<8x16xbf16>
    %cst_20 = arith.constant dense<0.000000e+00> : vector<16x768xf32>
    %63 = tpu.matmul %62, %1, %cst_20 {dimension_numbers = #tpu.dot_dimension_numbers<[0], [0], [1], [1], [0, 1, 1, 1], [], []>} : vector<8x16xbf16>, vector<8x768xbf16>, vector<16x768xf32> -> vector<16x768xf32>
    %cst_21 = arith.constant dense<0.000000e+00> : vector<16xf32>
    %64 = vector.multi_reduction <add>, %61, %cst_21 [0] : vector<8x16xf32> to vector<16xf32>
    %65 = vector.shape_cast %64 : vector<16xf32> to vector<1x16xf32>
    %cst_22 = arith.constant 1.000000e-03 : f32
    %66 = vector.broadcast %cst_22 : f32 to vector<16x768xf32>
    %67 = arith.mulf %66, %63 : vector<16x768xf32>
    %68 = arith.subf %2, %67 : vector<16x768xf32>
    %cst_23 = arith.constant 1.000000e-03 : f32
    %69 = vector.broadcast %cst_23 : f32 to vector<1x16xf32>
    %70 = arith.mulf %69, %65 : vector<1x16xf32>
    %71 = arith.subf %3, %70 : vector<1x16xf32>
    %c0_24 = arith.constant 0 : index
    %c0_25 = arith.constant 0 : index
    %72 = vector.load %arg3[%c0_24, %c0_25] : memref<8x16xf32, #tpu.memory_space<vmem>>, vector<8x16xf32>
    tpu.vector_store %arg3[%c0_24, %c0_25], %8 {strides = array<i32>} : memref<8x16xf32, #tpu.memory_space<vmem>>, vector<8x16xf32>,
    %c0_26 = arith.constant 0 : index
    %c0_27 = arith.constant 0 : index
    %73 = vector.load %arg4[%c0_26, %c0_27] : memref<16x768xf32, #tpu.memory_space<vmem>>, vector<16x768xf32>
    tpu.vector_store %arg4[%c0_26, %c0_27], %68 {strides = array<i32>} : memref<16x768xf32, #tpu.memory_space<vmem>>, vector<16x768xf32>,
    %c0_28 = arith.constant 0 : index
    %c0_29 = arith.constant 0 : index
    %74 = vector.load %arg5[%c0_28, %c0_29] : memref<1x16xf32, #tpu.memory_space<vmem>>, vector<1x16xf32>
    tpu.vector_store %arg5[%c0_28, %c0_29], %71 {strides = array<i32>} : memref<1x16xf32, #tpu.memory_space<vmem>>, vector<1x16xf32>,
    return
  }
}

</mosaic_0001>

<bundles_post_ra>
// kernel: tent_forward_and_adapt.1
= control target key start
LH: loop header
LB: loop body
LE: loop exit
PB: predicated region body
PF: predicated region fallthrough
CT: control target
= control target key end

     0   :  { %s729_s0 = inlined_call_operand.vmem [shape: f32[8,768], index: 0, kind: input, shape index: {}]   ;;  %s730_s1 = inlined_call_operand.vmem [shape: f32[16,768], index: 1, kind: input, shape index: {}, may-alias: {1,4}]   ;;  %s731_s2 = inlined_call_operand.vmem [shape: f32[1,16], index: 2, kind: input, shape index: {}, may-alias: {2,5}]   ;;  %s732_s3 = inlined_call_operand.hbm [shape: f32[8,16], index: 3, kind: output, shape index: {0}]   ;;  %s733_s4 = inlined_call_operand.vmem [shape: f32[16,768], index: 4, kind: output, shape index: {1}, may-alias: {1,4}]   ;;  %s734_s5 = inlined_call_operand.vmem [shape: f32[1,16], index: 5, kind: output, shape index: {2}, may-alias: {2,5}]  }
   0x1   :  { %v543_v0 = vld [vmem:[%s730_s1 + $0x8] sm:$0xff]  ;;  %v548_v1 = vld [vmem:[%s730_s1 + $0x38] sm:$0xff]  ;;  %v553_v2 = vld [vmem:[%s730_s1] sm:$0xff] }
   0x2   :  { %v45_v3 = vpack.c.bf16 %v548_v1, %v543_v0  ;;  %v560_v4 = vld [vmem:[%s730_s1 + $0x30] sm:$0xff]  ;;  %v565_v5 = vld [vmem:[%s730_s1 + $0x18] sm:$0xff]  ;;  %v570_v6 = vld [vmem:[%s730_s1 + $0x48] sm:$0xff] }
   0x3   :  { %v44_v7 = vpack.c.bf16 %v560_v4, %v553_v2  ;;  %v47_v8 = vpack.c.bf16 %v570_v6, %v565_v5  ;;  %v579_v9 = vld [vmem:[%s730_s1 + $0x10] sm:$0xff]  ;;  %v584_v10 = vld [vmem:[%s730_s1 + $0x40] sm:$0xff]  ;;  %v20_v11 = vld [vmem:[%s729_s0 + $0x8] sm:$0xff] }
   0x4   :  { %70 = vmatprep.subr.bf16.mxu0 %v45_v3  ;;  %v46_v12 = vpack.c.bf16 %v584_v10, %v579_v9  ;;  %v591_v13 = vpack.c.bf16 %v20_v11, %v20_v11  ;;  %v22_v14 = vld [vmem:[%s729_s0 + $0x18] sm:$0xff]  ;;  %v599_v15 = vld [vmem:[%s730_s1 + $0x28] sm:$0xff]  ;;  %v19_v16 = vld [vmem:[%s729_s0] sm:$0xff] }
   0x5   :  { %71 = vmatpush1.bf16.xpose.msra.mxu0 %v44_v7  ;;  %110 = vmatprep.subr.bf16.mxu1 %v47_v8  ;;  %v604_v17 = vpack.c.bf16 %v22_v14, %v22_v14  ;;  %v609_v18 = vld [vmem:[%s730_s1 + $0x58] sm:$0xff]  ;;  %v21_v20 = vld [vmem:[%s729_s0 + $0x10] sm:$0xff]  ;;  %v620_v21 = vld [vmem:[%s730_s1 + $0x20] sm:$0xff] }
   0x6   :  { %111 = vmatpush1.bf16.xpose.msra.mxu1 %v46_v12  ;;  %88 = vmatprep.mubr.bf16.mxu0 %v591_v13  ;;  %v49_v19 = vpack.c.bf16 %v609_v18, %v599_v15  ;;  %v625_v22 = vld [vmem:[%s730_s1 + $0x50] sm:$0xff]  ;;  %v24_v23 = vld [vmem:[%s729_s0 + $0x28] sm:$0xff] }
   0x7   :  { %128 = vmatprep.mubr.bf16.mxu1 %v604_v17 }
   0x8   :  { %11 = vsyncpa [#allocation3], 0  ;;  %v631_v24 = vpack.c.bf16 %v19_v16, %v19_v16  ;;  %150 = vmatprep.subr.bf16.mxu0 %v49_v19  ;;  %v633_v25 = vpack.c.bf16 %v21_v20, %v21_v20  ;;  %v48_v26 = vpack.c.bf16 %v625_v22, %v620_v21  ;;  %v637_v27 = vpack.c.bf16 %v24_v23, %v24_v23  ;;  %v23_v28 = vld [vmem:[%s729_s0 + $0x20] sm:$0xff]  ;;  %s509_s30 = smov [#allocation2]  }
   0x9   :  { %v645_v29 = vpack.c.bf16 %v23_v28, %v23_v28  ;;  %v51_v30 = vlaneseq  ;;  %v651_v33 = vld [vmem:[%s731_s2] sm:$0x1]  ;;  %vm176_vm0 = vcmask 130048   ;;  %vm254_vm4 = vcmask 1043456   ;;  %s456_s6 = sshll.u32 %s509_s30, 4  ;;  %s457_s6 = int_to_ptr.vmem [resolvable:$true] %s456_s6 }
   0xa   :  { %472 = vmatprep.subr.msk.bf16.mxu1 %vm254_vm4, %v591_v13  ;;  %vm448_vm6 = vcmask 122880   ;;  %vm250_vm7 = vcmask 64512   ;;  %s486_s7 = scalar_lea.vmem %s457_s6, 128  ;;  %p491_p1 = scmp.lt.s32.totalorder %s457_s6, %s457_s6 }
   0xb   :  { %v52_v31 = vshrl.u32 %v51_v30, 7  ;;  %v200_v60 = vand.u32 127, %v51_v30  ;;  %p487_p0 = scmp.ne.s32.totalorder %s457_s6, %s486_s7  ;;  %p492_p2 = scmp.lt.s32.totalorder %s486_s7, %s486_s7 }
   0xc   :  { %89 = vmatmul.mubr.bf16.vlgmr.msra.gmra.mxu0 %v631_v24 }
   0xd   :  { %129 = vmatmul.mubr.bf16.vlgmr.msra.gmra.mxu1 %v633_v25  ;;  %151 = vmatpush1.bf16.xpose.msra.mxu0 %v48_v26  ;;  %v53_v32 = vsub.s32 0, %v52_v31  ;;  %p493_p3 = por %p492_p2, %p491_p1 }
   0xe   :  { %168 = vmatprep.mubr.bf16.mxu0 %v637_v27  ;;  %474 = vmatprep.subr.msk.bf16.mxu0 %vm254_vm4, %v604_v17 }
   0xf   :  { %v54_v34 = vrot.slane %v651_v33, %v53_v32  ;;  %p494_p4 = pnand %p493_p3, %p487_p0 }
  0x14   :  { %169 = vmatmul.mubr.bf16.vlgmr.msra.gmra.mxu0 %v645_v29 }
  0xcc   :  { %v90_v35 = vpop.f32.mrf.mxu0 }
  0xcd   :  { %v130_v36 = vpop.f32.mrf.mxu1  ;;  %v91_v38 = vadd.f32 %v90_v35, %v54_v34 }
  0xce   :  { %v92_v37 = vpop.f32.mrf.mxu0 }
  0xcf   :  { %v132_v39 = vpop.f32.mrf.mxu1  ;;  %v131_v43 = vadd.f32 %v130_v36, %v91_v38  ;;  %v256_v37 = vsel %vm254_vm4, %v631_v24, 0  ;;  %v262_v38 = vsel %vm254_vm4, %v633_v25, 0 }
  0xd0   :  { %v93_v40 = vpop.f32.mrf.mxu0  ;;  %288 = vmatpush1.bf16.msra.mxu1 %v256_v37  ;;  %331 = vmatpush1.bf16.msra.mxu0 %v262_v38  ;;  %v508_v39 = vmov 0  }
  0xd1   :  { %v133_v41 = vpop.f32.mrf.mxu1  ;;  %305 = vmatprep.mubr.bf16.mxu1 %v508_v39  ;;  %348 = vmatprep.mubr.bf16.mxu0 %v508_v39 }
  0xd2   :  { %v94_v42 = vpop.f32.mrf.mxu0  ;;  %476 = vmatprep.subr.msk.bf16.mxu1 %vm254_vm4, %v637_v27 }
  0xd3   :  { %v134_v44 = vpop.f32.mrf.mxu1 }
  0xd4   :  { %v170_v45 = vpop.f32.mrf.mxu0 }
  0xd5   :  { %v171_v46 = vadd.f32 %v170_v45, %v131_v43 }
  0xd6   :  { %v172_v47 = vpop.f32.mrf.mxu0 }
  0xd7   :  { %v177_v48 = vsel %vm176_vm0, %v171_v46, -inf  ;;  %435 = vst.msk [vmem:[#allocation2] sm:$0xff] %vm176_vm0, %v171_v46 }
  0xd8   :  { %v173_v49 = vpop.f32.mrf.mxu0  ;;  %178 = vmax.xlane.f32.xlu0 %v177_v48 }
  0xda   :  { %v174_v50 = vpop.f32.mrf.mxu0 }
 0x161   :  { %v179_v51 = vpop.xlane.xlu0 %178 }
 0x162   :  { %v180_v52 = vsub.f32 %v171_v46, %v179_v51 }
 0x164   :  { %v181_v53 = vmul.f32 1.442695, %v180_v52 }
 0x166   :  { %480 = vpow2.f32 %v181_v53 }
 0x173   :  { %v481_v54 = vpop.eup %480 }
 0x174   :  { %v183_v55 = vsel %vm176_vm0, %v481_v54, 0.0 }
 0x175   :  { %184 = vadd.xlane.f32.xlu0 %v183_v55 }
 0x1fe   :  { %v185_v56 = vpop.xlane.xlu0 %184 }
 0x1ff   :  { %482 = vrcp.f32 %v185_v56 }
 0x200   :  { %484 = vlog2.f32 %v185_v56 }
 0x20c   :  { %v483_v57 = vpop.eup %482 }
 0x20d   :  { %v187_v58 = vmul.f32 %v483_v57, %v481_v54  ;;  %v485_v8 = vpop.eup %484  ;;  %v268_v57 = vsel %vm254_vm4, %v645_v29, 0 }
 0x20e   :  { %v189_v11 = vmul.f32 0.6931472, %v485_v8 }
 0x20f   :  { %v196_v59 = vsel %vm176_vm0, %v187_v58, -inf }
 0x210   :  { %197 = vmax.xlane.f32.xlu1 %v196_v59  ;;  %v190_v14 = vsub.f32 %v180_v52, %v189_v11 }
 0x212   :  { %v191_v23 = vmul.f32 %v190_v14, %v187_v58 }
 0x214   :  { %v192_v26 = vsel %vm176_vm0, %v191_v23, 0.0 }
 0x299   :  { %v198_v61 = vpop.xlane.xlu1 %197 }
 0x29a   :  { %vm201_vm1 = vcmp.ge.f32.partialorder %v187_v58, %v198_v61  ;;  %vm223_vm5 = vcmp.gt.f32.partialorder %v198_v61, 0.5 }
 0x29b   :  { %v202_v62 = vsel %vm201_vm1, %v200_v60, 16 }
 0x29c   :  { %v203_v63 = vsel %vm176_vm0, %v202_v62, 2147483647 }
 0x29d   :  { %v205_v3 = vshra.s32 %v203_v63, 16  ;;  %v204_v12 = vand.u32 65535, %v203_v63 }
 0x29f   :  { %v207_v7 = vcvt.s32.f32 %v205_v3  ;;  %v206_v19 = vcvt.s32.f32 %v204_v12 }
 0x2a1   :  { %208 = vmin.xlane.f32.xlu1 %v207_v7 }
 0x32a   :  { %v209_v16 = vpop.xlane.xlu1 %208 }
 0x32b   :  { %vm210_vm2 = vcmp.eq.f32.partialorder %v207_v7, %v209_v16  ;;  %v215_v28 = vcvt.f32.s32 %v209_v16 }
 0x32c   :  { %v211_v20 = vsel %vm210_vm2, %v206_v19, inf }
 0x32d   :  { %212 = vmin.xlane.f32.xlu0 %v211_v20  ;;  %v216_v31 = vshll.u32 %v215_v28, 16 }
 0x331   :  { %193 = vadd.xlane.f32.xlu0 %v192_v26 }
 0x3b6   :  { %v213_v30 = vpop.xlane.xlu0 %212 }
 0x3b7   :  { %v214_v32 = vcvt.f32.s32 %v213_v30 }
 0x3b9   :  { %v217_v34 = vadd.s32 %v216_v31, %v214_v32 }
 0x3ba   :  { %v194_v40 = vpop.xlane.xlu0 %193 }
 0x3bb   :  { %vm218_vm3 = vcmp.eq.s32.totalorder %v200_v60, %v217_v34  ;;  %v195_v41 = vsub.f32 0.0, %v194_v40 }
 0x3bc   :  { %v219_v35 = vsel %vm218_vm3, -inf, %v187_v58 }
 0x3bd   :  { %v220_v36 = vsel %vm176_vm0, %v219_v35, -inf  ;;  %v229_v13 = vadd.f32 %v195_v41, %v190_v14 }
 0x3be   :  { %221 = vmax.xlane.f32.xlu1 %v220_v36 }
 0x3bf   :  { %v230_v44 = vmul.f32 %v229_v13, %v187_v58 }
 0x3c1   :  { %v231_v46 = vsub.f32 0.0, %v230_v44 }
 0x447   :  { %v222_v42 = vpop.xlane.xlu1 %221 }
 0x448   :  { %v224_v43 = vsub.f32 %v198_v61, %v222_v42 }
 0x44a   :  { %v225_v24 = vsub.f32 1.0, %v224_v43 }
 0x44c   :  { %v226_v17 = vsel %vm223_vm5, %v225_v24, 0.0 }
 0x44d   :  { %v227_v45 = vsub.f32 1.0, %v226_v17 }
 0x44f   :  { %v228_v25 = vmul.f32 0.125, %v227_v45 }
 0x451   :  { %v232_v47 = vmul.f32 %v231_v46, %v228_v25 }
 0x453   :  { %v233_v48 = vpack.c.bf16 %v232_v47, %v232_v47  ;;  %v402_v49 = vsel %vm176_vm0, %v232_v47, 0.0 }
 0x454   :  { %v403_v50 = vrot.slane %v402_v49, 4 }
 0x455   :  { %234 = vxpose.xlu1.c.b16.start.end [1/1] (short) (narrow) %v233_v48, 16 }
 0x456   :  { %v404_v51 = vadd.f32 %v403_v50, %v402_v49 }
 0x458   :  { %v405_v27 = vrot.slane %v404_v51, 2 }
 0x45a   :  { %v406_v52 = vadd.f32 %v405_v27, %v404_v51 }
 0x45c   :  { %v407_v53 = vrot.slane %v406_v52, 1 }
 0x45e   :  { %v408_v54 = vadd.f32 %v407_v53, %v406_v52 }
 0x460   :  { %v433_v55 = vmul.f32 0.001, %v408_v54 }
 0x462   :  { %v434_v56 = vsub.f32 %v651_v33, %v433_v55 }
 0x464   :  { %449 = vst.msk [vmem:[%s734_s5] sm:$0x1] %vm448_vm6, %v434_v56 }
 0x4b7   :  { %v242_v58 = vpop.trf.xlu1 }
 0x4b8   :  { %473 = vmatmul.mubr.msk.bf16.vlgmr.msra.gmra.mxu1 %vm250_vm7, %v242_v58  ;;  %475 = vmatmul.mubr.msk.bf16.vlgmr.msra.gmra.mxu0 %vm250_vm7, %v242_v58 }
 0x4b9   :  { %374 = vmatpush1.bf16.msra.mxu1 %v268_v57  ;;  %391 = vmatprep.mubr.bf16.mxu1 %v508_v39 }
 0x4c0   :  { %477 = vmatmul.mubr.msk.bf16.vlgmr.msra.gmra.mxu1 %vm250_vm7, %v242_v58 }
 0x4c1   :  { %497 = shalt.err (!%p494_p4)
}
 0x4c2   :  { %459 = dma.vmem_to_hbm [thread:$0]  %s457_s6, 128, %s732_s3, [#allocation3]  }
 0x578   :  { %v307_v29 = vpop.f32.mrf.mxu1  ;;  %v350_v33 = vpop.f32.mrf.mxu0 }
 0x579   :  { %v409_v59 = vmul.f32 0.001, %v307_v29  ;;  %v411_v60 = vmul.f32 0.001, %v350_v33 }
 0x57a   :  { %v309_v61 = vpop.f32.mrf.mxu1  ;;  %v352_v62 = vpop.f32.mrf.mxu0 }
 0x57b   :  { %v421_v63 = vsub.f32 %v553_v2, %v409_v59  ;;  %v423_v3 = vsub.f32 %v579_v9, %v411_v60  ;;  %v410_v7 = vmul.f32 0.001, %v309_v61  ;;  %v412_v8 = vmul.f32 0.001, %v352_v62 }
 0x57c   :  { %v311_v11 = vpop.f32.mrf.mxu1  ;;  %v354_v12 = vpop.f32.mrf.mxu0 }
 0x57d   :  { %436 = vst [vmem:[%s733_s4] sm:$0xff] %v421_v63  ;;  %438 = vst [vmem:[%s733_s4 + $0x10] sm:$0xff] %v423_v3  ;;  %v422_v14 = vsub.f32 %v543_v0, %v410_v7  ;;  %v424_v16 = vsub.f32 %v565_v5, %v412_v8  ;;  %v415_v19 = vmul.f32 0.001, %v311_v11  ;;  %v417_v2 = vmul.f32 0.001, %v354_v12 }
 0x57e   :  { %v313_v20 = vpop.f32.mrf.mxu1  ;;  %v356_v9 = vpop.f32.mrf.mxu0 }
 0x57f   :  { %437 = vst [vmem:[%s733_s4 + $0x8] sm:$0xff] %v422_v14  ;;  %439 = vst [vmem:[%s733_s4 + $0x18] sm:$0xff] %v424_v16  ;;  %v427_v23 = vsub.f32 %v560_v4, %v415_v19  ;;  %v429_v26 = vsub.f32 %v584_v10, %v417_v2  ;;  %v416_v28 = vmul.f32 0.001, %v313_v20  ;;  %v418_v0 = vmul.f32 0.001, %v356_v9 }
 0x580   :  { %v393_v30 = vpop.f32.mrf.mxu1 }
 0x581   :  { %442 = vst [vmem:[%s733_s4 + $0x30] sm:$0xff] %v427_v23  ;;  %444 = vst [vmem:[%s733_s4 + $0x40] sm:$0xff] %v429_v26  ;;  %v428_v5 = vsub.f32 %v548_v1, %v416_v28  ;;  %v430_v31 = vsub.f32 %v570_v6, %v418_v0  ;;  %v413_v32 = vmul.f32 0.001, %v393_v30 }
 0x582   :  { %v395_v34 = vpop.f32.mrf.mxu1 }
 0x583   :  { %443 = vst [vmem:[%s733_s4 + $0x38] sm:$0xff] %v428_v5  ;;  %445 = vst [vmem:[%s733_s4 + $0x48] sm:$0xff] %v430_v31  ;;  %v425_v4 = vsub.f32 %v620_v21, %v413_v32  ;;  %v414_v10 = vmul.f32 0.001, %v395_v34 }
 0x584   :  { %v397_v35 = vpop.f32.mrf.mxu1 }
 0x585   :  { %440 = vst [vmem:[%s733_s4 + $0x20] sm:$0xff] %v425_v4  ;;  %v426_v1 = vsub.f32 %v599_v15, %v414_v10  ;;  %v419_v6 = vmul.f32 0.001, %v397_v35 }
 0x586   :  { %v399_v36 = vpop.f32.mrf.mxu1 }
 0x587   :  { %441 = vst [vmem:[%s733_s4 + $0x28] sm:$0xff] %v426_v1  ;;  %v431_v37 = vsub.f32 %v625_v22, %v419_v6  ;;  %v420_v38 = vmul.f32 0.001, %v399_v36 }
 0x589   :  { %446 = vst [vmem:[%s733_s4 + $0x50] sm:$0xff] %v431_v37  ;;  %v432_v21 = vsub.f32 %v609_v18, %v420_v38 }
 0x58b   :  { %447 = vst [vmem:[%s733_s4 + $0x58] sm:$0xff] %v432_v21 }
 0x58c   :  { %506 = dma.done.wait [#allocation3], 128  }
 0x58d   :  { %507 = vsyncadd [#allocation3], 4294967168 }
 0x58e   :  { %471 = vsyncpa [#allocation3], 1 }

</bundles_post_ra>
